<compile_context>
chip_gen: v7x
topology: tpu7x:2x2x1
jax: 0.10.0
libtpu: 0.0.40
codegen_flags: <defaults>
</compile_context>

<pallas_src>
import functools

import jax
import jax.numpy as jnp
from jax.experimental import pallas as pl
from jax.experimental.pallas import tpu as pltpu

HIDDEN = 128             # hidden width of the PyTorch model
DEFAULT_TILE_B = 1024    # batch rows per grid step (multiple of 256 keeps the MXU streamed)
DEFAULT_VMEM_LIMIT = 32 * 1024 * 1024   # default scoped VMEM on v6e/v7x
MAX_VMEM_LIMIT = 60 * 1024 * 1024       # stay under v7x's 64 MiB physical per-TC VMEM


def _round_up(n, m):
    return ((n + m - 1) // m) * m


def _softmax_last(x, *, approx):
    # numerically stable softmax along the last (lane) axis == torch.softmax(dim=1)
    m = jnp.max(x, axis=-1, keepdims=True)
    e = jnp.exp(x - m)
    return e * pl.reciprocal(jnp.sum(e, axis=-1, keepdims=True), approx=approx)


def mlp_kernel(x_ref,
               w1_ref, b1_ref,
               w2_ref, b2_ref,
               w34_ref, b34_ref,
               out_ref):
    f32 = jnp.float32
    bf16 = jnp.bfloat16

    # bf16 cast in-kernel (cheap VPU op hidden under the matmul; avoids a wrapper copy)
    x = x_ref[...].astype(bf16)

    # linear1 (bf16 operands, f32 accum) + softmax(dim=1)
    h = jnp.dot(x, w1_ref[...], preferred_element_type=f32) + b1_ref[...]
    h = _softmax_last(h, approx=True)           # internal softmax: approx rcp on EUP

    # linear2 + relu
    h = jnp.dot(h.astype(bf16), w2_ref[...], preferred_element_type=f32) + b2_ref[...]
    h = jnp.maximum(h, 0.0)

    # fused linear3·linear4 (W34 = w3 @ w4, B34 = b3 @ w4 + b4) + softmax(dim=1)
    h = jnp.dot(h.astype(bf16), w34_ref[...], preferred_element_type=f32) + b34_ref[...]
    h = _softmax_last(h, approx=False)          # user-visible probs: exact reciprocal

    out_ref[...] = h.astype(out_ref.dtype)


@functools.partial(jax.jit, static_argnames=("tile_b",))
def myself_torch_model_forward(x, params, *, tile_b=DEFAULT_TILE_B):
    """Pallas forward pass. x: (B, input_dim) float32. Returns (B, out_dim) softmax probs."""
    (w1, b1, w2, b2, w3, b3, w4, b4) = params
    B, input_dim = x.shape
    hidden = w1.shape[1]
    out_dim = w4.shape[1]

    # Fuse linear3 -> linear4 (no nonlinearity between them). f32 product, bf16 operand.
    w34 = jnp.dot(w3, w4, preferred_element_type=jnp.float32)
    b34 = jnp.dot(b3, w4, preferred_element_type=jnp.float32) + b4

    w1b = w1.astype(jnp.bfloat16)
    w2b = w2.astype(jnp.bfloat16)
    w34b = w34.astype(jnp.bfloat16)

    # batch tile: multiple of 8 sublanes, never wildly larger than B
    tb = max(8, min(tile_b, _round_up(B, 8)))
    grid = (pl.cdiv(B, tb),)

    def resident(r, c):  # full-array block, constant index_map -> stays in VMEM
        return pl.BlockSpec((r, c), lambda i: (0, 0))

    # VMEM budget guard (resident weights + double-buffered x/out tiles + intermediates)
    weight_bytes = 2 * 2 * (input_dim * hidden + hidden * hidden + hidden * out_dim) \
        + 4 * hidden * 3 + 4 * out_dim
    tile_bytes = 2 * tb * input_dim * 4 + 2 * tb * out_dim * 4 + 4 * tb * hidden * 4
    vmem_est = weight_bytes + tile_bytes
    compiler_kwargs = dict(dimension_semantics=("parallel",))
    if vmem_est > DEFAULT_VMEM_LIMIT:
        compiler_kwargs["vmem_limit_bytes"] = min(int(vmem_est * 1.25), MAX_VMEM_LIMIT)
    # TODO(synk): for very large input_dim, tile w1 along K (extra grid axis) instead of
    # keeping it fully resident; not needed at these model sizes.

    cost = pl.CostEstimate(
        flops=2 * B * (input_dim * hidden + hidden * hidden + hidden * out_dim),
        transcendentals=B * (hidden + out_dim),
        bytes_accessed=x.size * 4 + B * out_dim * 4 + weight_bytes // 2,
    )

    out = pl.pallas_call(
        mlp_kernel,
        out_shape=jax.ShapeDtypeStruct((B, out_dim), jnp.float32),
        grid=grid,
        in_specs=[
            pl.BlockSpec((tb, input_dim), lambda i: (i, 0)),   # x tile (pipelined, f32)
            resident(input_dim, hidden),                       # w1 (bf16)
            resident(1, hidden),                               # b1 (f32)
            resident(hidden, hidden),                          # w2 (bf16)
            resident(1, hidden),                               # b2 (f32)
            resident(hidden, out_dim),                         # w3@w4 (bf16)
            resident(1, out_dim),                              # b3@w4+b4 (f32)
        ],
        out_specs=pl.BlockSpec((tb, out_dim), lambda i: (i, 0)),
        compiler_params=pltpu.CompilerParams(**compiler_kwargs),
        cost_estimate=cost,
    )(x, w1b, b1, w2b, b2, w34b, b34)

    return out


def init_params(key, input_dim, out_dim):
    """Deterministic parameter init (PyTorch nn.Linear-like uniform fan-in scaling)."""
    def linear(k, fan_in, fan_out):
        kw, kb = jax.random.split(k)
        bound = 1.0 / jnp.sqrt(fan_in)
        w = jax.random.uniform(kw, (fan_in, fan_out), jnp.float32, -bound, bound)
        b = jax.random.uniform(kb, (1, fan_out), jnp.float32, -bound, bound)
        return w, b

    k1, k2, k3, k4 = jax.random.split(key, 4)
    w1, b1 = linear(k1, input_dim, HIDDEN)
    w2, b2 = linear(k2, HIDDEN, HIDDEN)
    w3, b3 = linear(k3, HIDDEN, HIDDEN)
    w4, b4 = linear(k4, HIDDEN, out_dim)
    return (w1, b1, w2, b2, w3, b3, w4, b4)


def reference_forward(x, params):
    """Pure-JAX reference mirroring the kernel's math (bf16 operands / f32 accumulation,
    fused linear3·linear4). Exact softmax reciprocals; the only unmatched term is the
    approx reciprocal in the kernel's internal softmax."""
    (w1, b1, w2, b2, w3, b3, w4, b4) = params
    bf16 = jnp.bfloat16

    def mm(a, w):
        return jnp.dot(a.astype(bf16), w.astype(bf16),
                       preferred_element_type=jnp.float32)

    w34 = jnp.dot(w3, w4, preferred_element_type=jnp.float32)
    b34 = jnp.dot(b3, w4, preferred_element_type=jnp.float32) + b4

    h = mm(x, w1) + b1
    h = jax.nn.softmax(h, axis=1)
    h = mm(h, w2) + b2
    h = jax.nn.relu(h)
    h = mm(h, w34) + b34
    return jax.nn.softmax(h, axis=1)


# TODO(synk): the training branch (cross_entropy loss when y_true is given) is not
# implemented in the kernel; only the inference forward is fused.

if __name__ == "__main__":
    key = jax.random.PRNGKey(0)
    kx, kp = jax.random.split(key)

    batch, input_dim, out_dim = 8, 32, 16
    x = jax.random.normal(kx, (batch, input_dim), dtype=jnp.float32)
    params = init_params(kp, input_dim, out_dim)

    y = myself_torch_model_forward(x, params)
    y = jax.block_until_ready(y)

    y_ref = reference_forward(x, params)
    assert y.shape == (batch, out_dim)
    # Reference mirrors the kernel's bf16 matmuls and the W34 fusion; the only
    # unmatched term is the approx reciprocal in the internal softmax.
    assert jnp.allclose(y, y_ref, atol=5e-3, rtol=5e-3), "mismatch vs reference"
    # output softmax rows must sum to 1 (exact reciprocal on the final softmax)
    assert jnp.allclose(jnp.sum(y, axis=1), 1.0, atol=1e-5), "rows do not sum to 1"

    print("KERNEL_OK")
</pallas_src>

<mosaic_0001>
module attributes {stable_mosaic.version = 11 : i64} {
  func.func @mlp_kernel(%arg0: i32, %arg1: memref<8x32xf32, #tpu.memory_space<vmem>>, %arg2: memref<32x128xbf16, #tpu.memory_space<vmem>>, %arg3: memref<1x128xf32, #tpu.memory_space<vmem>>, %arg4: memref<128x128xbf16, #tpu.memory_space<vmem>>, %arg5: memref<1x128xf32, #tpu.memory_space<vmem>>, %arg6: memref<128x16xbf16, #tpu.memory_space<vmem>>, %arg7: memref<1x16xf32, #tpu.memory_space<vmem>>, %arg8: memref<8x16xf32, #tpu.memory_space<vmem>>) attributes {dimension_semantics = [#tpu.dimension_semantics<parallel>], iteration_bounds = array<i64: 1>, scalar_prefetch = 0 : i64, scratch_operands = 0 : i64, tpu.core_type = #tpu.core_type<tc>, window_params = [{transform_indices = @transform_0, window_bounds = array<i64: 8, 32>}, {pipeline_mode = #tpu.pipeline_mode<synchronous>, transform_indices = @transform_1, window_bounds = array<i64: 32, 128>}, {pipeline_mode = #tpu.pipeline_mode<synchronous>, transform_indices = @transform_2, window_bounds = array<i64: 1, 128>}, {pipeline_mode = #tpu.pipeline_mode<synchronous>, transform_indices = @transform_3, window_bounds = array<i64: 128, 128>}, {pipeline_mode = #tpu.pipeline_mode<synchronous>, transform_indices = @transform_4, window_bounds = array<i64: 1, 128>}, {pipeline_mode = #tpu.pipeline_mode<synchronous>, transform_indices = @transform_5, window_bounds = array<i64: 128, 16>}, {pipeline_mode = #tpu.pipeline_mode<synchronous>, transform_indices = @transform_6, window_bounds = array<i64: 1, 16>}, {transform_indices = @transform_7, window_bounds = array<i64: 8, 16>}]} {
    %c0 = arith.constant 0 : index
    %c0_0 = arith.constant 0 : index
    %0 = vector.load %arg1[%c0, %c0_0] : memref<8x32xf32, #tpu.memory_space<vmem>>, vector<8x32xf32>
    %1 = arith.truncf %0 : vector<8x32xf32> to vector<8x32xbf16>
    %c0_1 = arith.constant 0 : index
    %c0_2 = arith.constant 0 : index
    %2 = vector.load %arg2[%c0_1, %c0_2] : memref<32x128xbf16, #tpu.memory_space<vmem>>, vector<32x128xbf16>
    %cst = arith.constant dense<0.000000e+00> : vector<8x128xf32>
    %3 = tpu.matmul %1, %2, %cst {dimension_numbers = #tpu.dot_dimension_numbers<[1], [0], [0], [1], [0, 0, 1, 1], [], []>} : vector<8x32xbf16>, vector<32x128xbf16>, vector<8x128xf32> -> vector<8x128xf32>
    %c0_3 = arith.constant 0 : index
    %c0_4 = arith.constant 0 : index
    %4 = vector.load %arg3[%c0_3, %c0_4] : memref<1x128xf32, #tpu.memory_space<vmem>>, vector<1x128xf32>
    %5 = vector.broadcast %4 : vector<1x128xf32> to vector<8x128xf32>
    %6 = arith.addf %3, %5 : vector<8x128xf32>
    %cst_5 = arith.constant dense<0xFF800000> : vector<8xf32>
    %7 = vector.multi_reduction <maximumf>, %6, %cst_5 [1] : vector<8x128xf32> to vector<8xf32>
    %8 = vector.shape_cast %7 : vector<8xf32> to vector<8x1xf32>
    %9 = vector.broadcast %8 : vector<8x1xf32> to vector<8x128xf32>
    %10 = arith.subf %6, %9 : vector<8x128xf32>
    %11 = math.exp %10 : vector<8x128xf32>
    %cst_6 = arith.constant dense<0.000000e+00> : vector<8xf32>
    %12 = vector.multi_reduction <add>, %11, %cst_6 [1] : vector<8x128xf32> to vector<8xf32>
    %13 = vector.shape_cast %12 : vector<8xf32> to vector<8x1xf32>
    %14 = tpu.reciprocal %13 {approx = true} : vector<8x1xf32> -> vector<8x1xf32>
    %15 = vector.broadcast %14 : vector<8x1xf32> to vector<8x128xf32>
    %16 = arith.mulf %11, %15 : vector<8x128xf32>
    %17 = arith.truncf %16 : vector<8x128xf32> to vector<8x128xbf16>
    %c0_7 = arith.constant 0 : index
    %c0_8 = arith.constant 0 : index
    %18 = vector.load %arg4[%c0_7, %c0_8] : memref<128x128xbf16, #tpu.memory_space<vmem>>, vector<128x128xbf16>
    %cst_9 = arith.constant dense<0.000000e+00> : vector<8x128xf32>
    %19 = tpu.matmul %17, %18, %cst_9 {dimension_numbers = #tpu.dot_dimension_numbers<[1], [0], [0], [1], [0, 0, 1, 1], [], []>} : vector<8x128xbf16>, vector<128x128xbf16>, vector<8x128xf32> -> vector<8x128xf32>
    %c0_10 = arith.constant 0 : index
    %c0_11 = arith.constant 0 : index
    %20 = vector.load %arg5[%c0_10, %c0_11] : memref<1x128xf32, #tpu.memory_space<vmem>>, vector<1x128xf32>
    %21 = vector.broadcast %20 : vector<1x128xf32> to vector<8x128xf32>
    %22 = arith.addf %19, %21 : vector<8x128xf32>
    %cst_12 = arith.constant 0.000000e+00 : f32
    %23 = vector.broadcast %cst_12 : f32 to vector<8x128xf32>
    %24 = arith.maximumf %22, %23 : vector<8x128xf32>
    %25 = arith.truncf %24 : vector<8x128xf32> to vector<8x128xbf16>
    %c0_13 = arith.constant 0 : index
    %c0_14 = arith.constant 0 : index
    %26 = vector.load %arg6[%c0_13, %c0_14] : memref<128x16xbf16, #tpu.memory_space<vmem>>, vector<128x16xbf16>
    %cst_15 = arith.constant dense<0.000000e+00> : vector<8x16xf32>
    %27 = tpu.matmul %25, %26, %cst_15 {dimension_numbers = #tpu.dot_dimension_numbers<[1], [0], [0], [1], [0, 0, 1, 1], [], []>} : vector<8x128xbf16>, vector<128x16xbf16>, vector<8x16xf32> -> vector<8x16xf32>
    %c0_16 = arith.constant 0 : index
    %c0_17 = arith.constant 0 : index
    %28 = vector.load %arg7[%c0_16, %c0_17] : memref<1x16xf32, #tpu.memory_space<vmem>>, vector<1x16xf32>
    %29 = vector.broadcast %28 : vector<1x16xf32> to vector<8x16xf32>
    %30 = arith.addf %27, %29 : vector<8x16xf32>
    %cst_18 = arith.constant dense<0xFF800000> : vector<8xf32>
    %31 = vector.multi_reduction <maximumf>, %30, %cst_18 [1] : vector<8x16xf32> to vector<8xf32>
    %32 = vector.shape_cast %31 : vector<8xf32> to vector<8x1xf32>
    %33 = vector.broadcast %32 : vector<8x1xf32> to vector<8x16xf32>
    %34 = arith.subf %30, %33 : vector<8x16xf32>
    %35 = math.exp %34 : vector<8x16xf32>
    %cst_19 = arith.constant dense<0.000000e+00> : vector<8xf32>
    %36 = vector.multi_reduction <add>, %35, %cst_19 [1] : vector<8x16xf32> to vector<8xf32>
    %37 = vector.shape_cast %36 : vector<8xf32> to vector<8x1xf32>
    %38 = tpu.reciprocal %37 : vector<8x1xf32> -> vector<8x1xf32>
    %39 = vector.broadcast %38 : vector<8x1xf32> to vector<8x16xf32>
    %40 = arith.mulf %35, %39 : vector<8x16xf32>
    %c0_20 = arith.constant 0 : index
    %c0_21 = arith.constant 0 : index
    %41 = vector.load %arg8[%c0_20, %c0_21] : memref<8x16xf32, #tpu.memory_space<vmem>>, vector<8x16xf32>
    tpu.vector_store %arg8[%c0_20, %c0_21], %40 {strides = array<i32>} : memref<8x16xf32, #tpu.memory_space<vmem>>, vector<8x16xf32>,
    return
  }
  func.func @transform_0(%arg0: i32) -> (i32, i32) {
    %c0_i32 = arith.constant 0 : i32
    %c0_i32_0 = arith.constant 0 : i32
    return %arg0, %c0_i32 : i32, i32
  }
  func.func @transform_1(%arg0: i32) -> (i32, i32) {
    %c0_i32 = arith.constant 0 : i32
    %c0_i32_0 = arith.constant 0 : i32
    %c0_i32_1 = arith.constant 0 : i32
    return %c0_i32, %c0_i32_0 : i32, i32
  }
  func.func @transform_2(%arg0: i32) -> (i32, i32) {
    %c0_i32 = arith.constant 0 : i32
    %c0_i32_0 = arith.constant 0 : i32
    %c0_i32_1 = arith.constant 0 : i32
    return %c0_i32, %c0_i32_0 : i32, i32
  }
  func.func @transform_3(%arg0: i32) -> (i32, i32) {
    %c0_i32 = arith.constant 0 : i32
    %c0_i32_0 = arith.constant 0 : i32
    %c0_i32_1 = arith.constant 0 : i32
    return %c0_i32, %c0_i32_0 : i32, i32
  }
  func.func @transform_4(%arg0: i32) -> (i32, i32) {
    %c0_i32 = arith.constant 0 : i32
    %c0_i32_0 = arith.constant 0 : i32
    %c0_i32_1 = arith.constant 0 : i32
    return %c0_i32, %c0_i32_0 : i32, i32
  }
  func.func @transform_5(%arg0: i32) -> (i32, i32) {
    %c0_i32 = arith.constant 0 : i32
    %c0_i32_0 = arith.constant 0 : i32
    %c0_i32_1 = arith.constant 0 : i32
    return %c0_i32, %c0_i32_0 : i32, i32
  }
  func.func @transform_6(%arg0: i32) -> (i32, i32) {
    %c0_i32 = arith.constant 0 : i32
    %c0_i32_0 = arith.constant 0 : i32
    %c0_i32_1 = arith.constant 0 : i32
    return %c0_i32, %c0_i32_0 : i32, i32
  }
  func.func @transform_7(%arg0: i32) -> (i32, i32) {
    %c0_i32 = arith.constant 0 : i32
    %c0_i32_0 = arith.constant 0 : i32
    return %arg0, %c0_i32 : i32, i32
  }
}

</mosaic_0001>

<bundles_post_ra>
// kernel: myself_torch_model_forward.1
= control target key start
LH: loop header
LB: loop body
LE: loop exit
PB: predicated region body
PF: predicated region fallthrough
CT: control target
= control target key end

     0   :  { %v502_v1 = vmov 0.0   ;;  %vm503_vm0 = vmmov 0   ;;  %vm53_vm1 = vcmask 261120   ;;  %s647_s0 = inlined_call_operand.vmem [shape: f32[8,32], index: 0, kind: input, shape index: {}]   ;;  %s648_s1 = inlined_call_operand.vmem [shape: bf16[32,128], index: 1, kind: input, shape index: {}]   ;;  %s649_s2 = inlined_call_operand.vmem [shape: f32[1,128], index: 2, kind: input, shape index: {}]   ;;  %s650_s3 = inlined_call_operand.vmem [shape: bf16[128,128], index: 3, kind: input, shape index: {}]   ;;  %s651_s4 = inlined_call_operand.vmem [shape: f32[1,128], index: 4, kind: input, shape index: {}]   ;;  %s652_s5 = inlined_call_operand.vmem [shape: bf16[128,16], index: 5, kind: input, shape index: {}]   ;;  %s653_s6 = inlined_call_operand.vmem [shape: f32[1,16], index: 6, kind: input, shape index: {}]   ;;  %s654_s7 = inlined_call_operand.hbm [shape: f32[8,16], index: 7, kind: output, shape index: {}]  }
   0x1   :  { %v452_v0 = vld [vmem:[%s648_s1] sm:$0xff]   ;;  %401 = vmatprep.subr.bf16.mxu0 %v502_v1  ;;  %409 = vmatprep.subr.bf16.mxu1 %v502_v1  ;;  %v453_v2 = vld [vmem:[%s648_s1 + $0x8] sm:$0xff]  }
   0x2   :  { %402 = vmatpush3.bf16.msra.mxu0 %v452_v0  ;;  %405 = vmatprep.mubr.msk.bf16.mxu0 %vm503_vm0, %v502_v1  ;;  %v28_v3 = vld [vmem:[%s647_s0] sm:$0xff] }
   0x3   :  { %403 = vmatprep.subr.bf16.mxu0 %v502_v1  ;;  %425 = vmatprep.mubr.msk.bf16.mxu1 %vm503_vm0, %v502_v1  ;;  %v29_v4 = vpack.c.bf16 %v28_v3, %v28_v3 }
   0x6   :  { %404 = vmatpush3.bf16.msra.mxu0 %v453_v2 }
   0x7   :  { %429 = vmatprep.subr.bf16.mxu0 %v502_v1 }
   0x9   :  { %406 = vmatmul.mubr.msk.bf16.vlgmr.msra.gmra.mrb[0].mxu0 %vm53_vm1, %v29_v4 }
   0xa   :  { %445 = vmatprep.mubr.msk.bf16.mxu0 %vm503_vm0, %v502_v1 }
   0xb   :  { %12 = vsyncpa [#allocation3], 0  ;;  %v358_v5 = vld [vmem:[%s649_s2] ss:$0 sm:$0xff]  ;;  %v455_v12 = vld [vmem:[%s650_s3 + $0x8] sm:$0xff]   ;;  %vm331_vm2 = vcmask 130048  }
   0xc   :  { %v454_v11 = vld [vmem:[%s650_s3] sm:$0xff]   ;;  %v456_v13 = vld [vmem:[%s650_s3 + $0x10] sm:$0xff]   ;;  %v457_v14 = vld [vmem:[%s650_s3 + $0x18] sm:$0xff]  }
   0xd   :  { %410 = vmatpush3.bf16.msra.mxu1 %v454_v11  ;;  %v458_v19 = vld [vmem:[%s650_s3 + $0x20] sm:$0xff]   ;;  %v459_v20 = vld [vmem:[%s650_s3 + $0x28] sm:$0xff]   ;;  %v460_v21 = vld [vmem:[%s650_s3 + $0x30] sm:$0xff]  }
   0xe   :  { %411 = vmatprep.subr.bf16.mxu1 %v502_v1  ;;  %v461_v22 = vld [vmem:[%s650_s3 + $0x38] sm:$0xff]   ;;  %v462_v23 = vld [vmem:[%s652_s5] sm:$0xff]   ;;  %v463_v24 = vld [vmem:[%s652_s5 + $0x8] sm:$0xff]  }
   0xf   :  { %430 = vmatpush3.bf16.msra.mxu0 %v462_v23  ;;  %v464_v25 = vld [vmem:[%s652_s5 + $0x10] sm:$0xff]   ;;  %v465_v26 = vld [vmem:[%s652_s5 + $0x18] sm:$0xff]   ;;  %v466_v27 = vld [vmem:[%s652_s5 + $0x20] sm:$0xff]  }
  0x10   :  { %431 = vmatprep.subr.bf16.mxu0 %v502_v1  ;;  %v467_v28 = vld [vmem:[%s652_s5 + $0x28] sm:$0xff]   ;;  %v468_v33 = vld [vmem:[%s652_s5 + $0x30] sm:$0xff]   ;;  %v469_v34 = vld [vmem:[%s652_s5 + $0x38] sm:$0xff]  }
  0x11   :  { %412 = vmatpush3.bf16.msra.mxu1 %v455_v12  ;;  %v362_v35 = vld [vmem:[%s651_s4] ss:$0 sm:$0xff]  ;;  %s504_s4 = smov [#allocation2]  }
  0x12   :  { %413 = vmatprep.subr.bf16.mxu1 %v502_v1  ;;  %v371_v43 = vld [vmem:[%s653_s6] ss:$0 sm:$0xff]  ;;  %s350_s5 = sshll.u32 %s504_s4, 4  ;;  %s351_s5 = int_to_ptr.vmem [resolvable:$true] %s350_s5 }
  0x13   :  { %432 = vmatpush3.bf16.msra.mxu0 %v463_v24  ;;  %s478_s6 = scalar_lea.vmem %s351_s5, 128  ;;  %p483_p1 = scmp.lt.s32.totalorder %s351_s5, %s351_s5 }
  0x14   :  { %433 = vmatprep.subr.bf16.mxu0 %v502_v1  ;;  %p479_p0 = scmp.ne.s32.totalorder %s351_s5, %s478_s6  ;;  %p484_p2 = scmp.lt.s32.totalorder %s478_s6, %s478_s6 }
  0x15   :  { %414 = vmatpush3.bf16.msra.mxu1 %v456_v13 }
  0x16   :  { %415 = vmatprep.subr.bf16.mxu1 %v502_v1  ;;  %p485_p3 = por %p484_p2, %p483_p1 }
  0x17   :  { %434 = vmatpush3.bf16.msra.mxu0 %v464_v25 }
  0x18   :  { %435 = vmatprep.subr.bf16.mxu0 %v502_v1  ;;  %p486_p4 = pnand %p485_p3, %p479_p0 }
  0x19   :  { %416 = vmatpush3.bf16.msra.mxu1 %v457_v14 }
  0x1a   :  { %417 = vmatprep.subr.bf16.mxu1 %v502_v1 }
  0x1b   :  { %436 = vmatpush3.bf16.msra.mxu0 %v465_v26 }
  0x1c   :  { %437 = vmatprep.subr.bf16.mxu0 %v502_v1 }
  0x1d   :  { %418 = vmatpush3.bf16.msra.mxu1 %v458_v19 }
  0x1e   :  { %419 = vmatprep.subr.bf16.mxu1 %v502_v1 }
  0x1f   :  { %438 = vmatpush3.bf16.msra.mxu0 %v466_v27 }
  0x20   :  { %439 = vmatprep.subr.bf16.mxu0 %v502_v1 }
  0x21   :  { %420 = vmatpush3.bf16.msra.mxu1 %v459_v20 }
  0x22   :  { %421 = vmatprep.subr.bf16.mxu1 %v502_v1 }
  0x23   :  { %440 = vmatpush3.bf16.msra.mxu0 %v467_v28 }
  0x24   :  { %441 = vmatprep.subr.bf16.mxu0 %v502_v1 }
  0x25   :  { %422 = vmatpush3.bf16.msra.mxu1 %v460_v21 }
  0x26   :  { %423 = vmatprep.subr.bf16.mxu1 %v502_v1 }
  0x27   :  { %442 = vmatpush3.bf16.msra.mxu0 %v468_v33 }
  0x28   :  { %443 = vmatprep.subr.bf16.mxu0 %v502_v1 }
  0x29   :  { %424 = vmatpush3.bf16.msra.mxu1 %v461_v22 }
  0x2b   :  { %444 = vmatpush3.bf16.msra.mxu0 %v469_v34 }
  0xdc   :  { %v91_v6 = vpop.f32.mrb[0].mxu0 }
  0xdd   :  { %v92_v7 = vadd.f32 %v358_v5, %v91_v6  ;;  %v407_v8 = vpop.f32.mrb[1].mxu0 }
  0xde   :  { %v94_v9 = vpop.f32.mrb[2].mxu0 }
  0xdf   :  { %97 = vmax.xlane.f32.xlu0 %v92_v7  ;;  %v408_v10 = vpop.f32.mrb[3].mxu0 }
 0x16c   :  { %v98_v15 = vpop.xlane.xlu0 %97 }
 0x16d   :  { %v99_v16 = vsub.f32 %v92_v7, %v98_v15 }
 0x16f   :  { %v100_v17 = vmul.f32 1.442695, %v99_v16 }
 0x171   :  { %470 = vpow2.f32 %v100_v17 }
 0x17b   :  { %v471_v18 = vpop.eup %470 }
 0x17c   :  { %102 = vadd.xlane.f32.xlu0 %v471_v18 }
 0x209   :  { %v103_v29 = vpop.xlane.xlu0 %102 }
 0x20a   :  { %472 = vrcp.f32 %v103_v29 }
 0x214   :  { %v473_v30 = vpop.eup %472 }
 0x215   :  { %v105_v31 = vmul.f32 %v473_v30, %v471_v18 }
 0x217   :  { %v106_v32 = vpack.c.bf16 %v105_v31, %v105_v31 }
 0x219   :  { %426 = vmatmul.mubr.bf16.vlgmr.msra.gmra.mrb[0].mxu1 %v106_v32 }
 0x2ec   :  { %v212_v36 = vpop.f32.mrb[0].mxu1 }
 0x2ed   :  { %v213_v37 = vadd.f32 %v362_v35, %v212_v36  ;;  %v427_v38 = vpop.f32.mrb[1].mxu1 }
 0x2ee   :  { %v215_v39 = vpop.f32.mrb[2].mxu1 }
 0x2ef   :  { %v218_v40 = vmax.f32 %v213_v37, 0.0  ;;  %v428_v41 = vpop.f32.mrb[3].mxu1 }
 0x2f1   :  { %v219_v42 = vpack.c.bf16 %v218_v40, %v218_v40 }
 0x2f3   :  { %446 = vmatmul.mubr.bf16.vlgmr.msra.gmra.mrb[4].mxu0 %v219_v42 }
 0x3c6   :  { %v325_v44 = vpop.f32.mrb[4].mxu0 }
 0x3c7   :  { %v326_v45 = vadd.f32 %v371_v43, %v325_v44  ;;  %v447_v46 = vpop.f32.mrb[5].mxu0 }
 0x3c8   :  { %v328_v47 = vpop.f32.mrb[6].mxu0 }
 0x3c9   :  { %v448_v48 = vpop.f32.mrb[7].mxu0  ;;  %v332_v49 = vsel %vm331_vm2, %v326_v45, -inf }
 0x3ca   :  { %333 = vmax.xlane.f32.xlu1 %v332_v49 }
 0x457   :  { %v334_v50 = vpop.xlane.xlu1 %333 }
 0x458   :  { %v335_v51 = vsub.f32 %v326_v45, %v334_v50 }
 0x45a   :  { %v336_v52 = vmul.f32 1.442695, %v335_v51 }
 0x45c   :  { %474 = vpow2.f32 %v336_v52 }
 0x466   :  { %v475_v53 = vpop.eup %474 }
 0x467   :  { %v338_v54 = vsel %vm331_vm2, %v475_v53, 0.0 }
 0x468   :  { %339 = vadd.xlane.f32.xlu1 %v338_v54 }
 0x4f5   :  { %v340_v55 = vpop.xlane.xlu1 %339 }
 0x4f6   :  { %476 = vrcp.f32 %v340_v55 }
 0x500   :  { %v477_v56 = vpop.eup %476 }
 0x501   :  { %v342_v57 = vmul.f32 %v477_v56, %v475_v53 }
 0x503   :  { %343 = vst.msk [vmem:[#allocation2] sm:$0xff] %vm331_vm2, %v342_v57 }
 0x504   :  { %489 = shalt.err (!%p486_p4)
}
 0x505   :  { %s490_s17 = scalar_lea.hbm %s654_s7, 128 }
 0x506   :  { %p491_p5 = scmp.ne.s32.totalorder %s654_s7, %s490_s17  ;;  %p494_p6 = scmp.lt.u32.totalorder %s490_s17, %s654_s7 }
 0x508   :  { %p496_p7 = pnand %p494_p6, %p491_p5 }
 0x50a   :  { %499 = shalt.err (!%p496_p7)
}
 0x50b   :  { %353 = dma.vmem_to_hbm [thread:$0]  %s351_s5, 128, %s654_s7, [#allocation3]  }
 0x50c   :  { %500 = dma.done.wait [#allocation3], 128  }
 0x50d   :  { %501 = vsyncadd [#allocation3], 4294967168 }
 0x50e   :  { %357 = vsyncpa [#allocation3], 1 }

</bundles_post_ra>
